<compile_context>
chip_gen: v6e
topology: v6e:2x2x1
jax: 0.10.0
libtpu: 0.0.40
codegen_flags: <defaults>
</compile_context>

<pallas_src>
import math

import jax
import jax.numpy as jnp
from jax.experimental import pallas as pl
from jax.experimental.pallas import tpu as pltpu


def munet_kernel(x_ref, w1_ref, b1_ref, w2_ref, b2_ref, w3_ref, b3_ref, o_ref):
    x = x_ref[...]                                                      # (3, tb)   batch on lanes
    h1 = jnp.dot(w1_ref[...], x, preferred_element_type=jnp.float32)   # (128, tb) MXU
    h1 = jnp.maximum(h1 + b1_ref[...], 0.0)                            # ReLU
    h2 = jnp.dot(w2_ref[...], h1, preferred_element_type=jnp.float32)  # (64, tb)  MXU
    h2 = jnp.maximum(h2 + b2_ref[...], 0.0)                            # ReLU
    # Layer 3 (64 -> 1): VPU multiply + cross-sublane reduce keeps the result lane-dense
    # and avoids a 1-wide MXU matmul feeding a lane-sparse store.
    h3 = jnp.sum(h2 * w3_ref[...], axis=0, keepdims=True) + b3_ref[0, 0]  # (1, tb)
    o_ref[...] = jnp.tanh(h3) * 2.0


def _pick_batch_tile(b_pad):
    """Pick a lane-aligned batch tile. `b_pad` is a multiple of 128."""
    if b_pad <= 128:
        return b_pad
    target = min(2048, b_pad // 2)           # keep >= 2 grid steps (v7x has 2 TensorCores)
    tb = max(128, (target // 128) * 128)
    while b_pad % tb:                        # tile must divide the padded batch
        tb -= 128
    return tb


def munet_forward(x, params, *, tb=None):
    """x: (B, 3) float32. params: PyTorch-layout weights (out, in), biases (out, 1)."""
    B, F = x.shape
    assert F == 3

    # Pad the batch up to a lane-friendly multiple of 128.
    b_pad = max(128, pl.cdiv(B, 128) * 128)
    if tb is None:
        tb = _pick_batch_tile(b_pad)
    assert b_pad % tb == 0 and (tb % 128 == 0 or tb == b_pad)

    # Lane-dense input: batch on the 128-lane axis; one contiguous (3, tb) DMA per grid step.
    xt = jnp.pad(x.T.astype(jnp.float32), ((0, 0), (0, b_pad - B)))

    w1, b1 = params["w1"], params["b1"]      # (128, 3), (128, 1)
    w2, b2 = params["w2"], params["b2"]      # (64, 128), (64, 1)
    w3, b3 = params["w3"].T, params["b3"]    # (64, 1),   (1, 1)

    out = pl.pallas_call(
        munet_kernel,
        out_shape=jax.ShapeDtypeStruct((1, b_pad), jnp.float32),
        grid_spec=pltpu.PrefetchScalarGridSpec(
            num_scalar_prefetch=0,
            grid=(b_pad // tb,),
            in_specs=[
                pl.BlockSpec((3, tb), lambda i: (0, i)),            # x tile (batch on lanes)
                pl.BlockSpec((128, 3), lambda i: (0, 0)),           # w1 (resident)
                pl.BlockSpec((128, 1), lambda i: (0, 0)),           # b1
                pl.BlockSpec((64, 128), lambda i: (0, 0)),          # w2
                pl.BlockSpec((64, 1), lambda i: (0, 0)),            # b2
                pl.BlockSpec((64, 1), lambda i: (0, 0)),            # w3 (used on VPU)
                pl.BlockSpec(memory_space=pltpu.MemorySpace.SMEM),  # b3 scalar in SMEM
            ],
            out_specs=pl.BlockSpec((1, tb), lambda i: (0, i)),      # lane-dense output row
        ),
        compiler_params=pltpu.CompilerParams(
            dimension_semantics=("parallel",),
        ),
    )(xt, w1, b1, w2, b2, w3, b3)

    return out[:, :B].T                                             # (B, 1)


def init_params(key):
    """Deterministic PyTorch-style init: U(-1/sqrt(fan_in), 1/sqrt(fan_in)); weights (out, in)."""
    dims = [(3, 128), (128, 64), (64, 1)]
    params = {}
    for n, (fan_in, fan_out) in enumerate(dims, start=1):
        key, kw, kb = jax.random.split(key, 3)
        bound = 1.0 / math.sqrt(fan_in)
        params[f"w{n}"] = jax.random.uniform(
            kw, (fan_out, fan_in), jnp.float32, -bound, bound)
        params[f"b{n}"] = jax.random.uniform(
            kb, (fan_out, 1), jnp.float32, -bound, bound)
    return params


def munet_ref(x, p):
    h1 = jax.nn.relu(x @ p["w1"].T + p["b1"].T)
    h2 = jax.nn.relu(h1 @ p["w2"].T + p["b2"].T)
    return jnp.tanh(h2 @ p["w3"].T + p["b3"].T) * 2.0


if __name__ == "__main__":
    key = jax.random.PRNGKey(0)
    kx, kp = jax.random.split(key)
    params = init_params(kp)

    # Small batch (matches the module's 3-feature input); exercises padding 8 -> 128.
    x_small = jax.random.normal(kx, (8, 3), dtype=jnp.float32)
    mu_small = jax.block_until_ready(munet_forward(x_small, params))
    assert mu_small.shape == (8, 1)
    assert jnp.allclose(mu_small, munet_ref(x_small, params), atol=1e-5, rtol=1e-5), \
        "small-batch mismatch vs JAX reference"

    # Non-multiple-of-128 batch exercises padding plus a multi-step (parallel) grid.
    x_big = jax.random.normal(kx, (300, 3), dtype=jnp.float32)
    mu_big = jax.block_until_ready(munet_forward(x_big, params))
    assert mu_big.shape == (300, 1)
    assert jnp.allclose(mu_big, munet_ref(x_big, params), atol=1e-5, rtol=1e-5), \
        "large-batch mismatch vs JAX reference"

    print("KERNEL_OK")
</pallas_src>

<mosaic_0001>
module attributes {stable_mosaic.version = 11 : i64} {
  func.func @munet_kernel(%arg0: i32, %arg1: memref<3x128xf32, #tpu.memory_space<vmem>>, %arg2: memref<128x3xf32, #tpu.memory_space<vmem>>, %arg3: memref<128x1xf32, #tpu.memory_space<vmem>>, %arg4: memref<64x128xf32, #tpu.memory_space<vmem>>, %arg5: memref<64x1xf32, #tpu.memory_space<vmem>>, %arg6: memref<64x1xf32, #tpu.memory_space<vmem>>, %arg7: memref<1x1xf32, #tpu.memory_space<smem>>, %arg8: memref<1x128xf32, #tpu.memory_space<vmem>>) attributes {dimension_semantics = [#tpu.dimension_semantics<parallel>], iteration_bounds = array<i64: 1>, scalar_prefetch = 0 : i64, scratch_operands = 0 : i64, tpu.core_type = #tpu.core_type<tc>, window_params = [{transform_indices = @transform_0, window_bounds = array<i64: 3, 128>}, {pipeline_mode = #tpu.pipeline_mode<synchronous>, transform_indices = @transform_1, window_bounds = array<i64: 128, 3>}, {pipeline_mode = #tpu.pipeline_mode<synchronous>, transform_indices = @transform_2, window_bounds = array<i64: 128, 1>}, {pipeline_mode = #tpu.pipeline_mode<synchronous>, transform_indices = @transform_3, window_bounds = array<i64: 64, 128>}, {pipeline_mode = #tpu.pipeline_mode<synchronous>, transform_indices = @transform_4, window_bounds = array<i64: 64, 1>}, {pipeline_mode = #tpu.pipeline_mode<synchronous>, transform_indices = @transform_5, window_bounds = array<i64: 64, 1>}, {transform_indices = @transform_6, window_bounds = array<i64: 1, 1>}, {transform_indices = @transform_7, window_bounds = array<i64: 1, 128>}]} {
    %c0 = arith.constant 0 : index
    %c0_0 = arith.constant 0 : index
    %0 = vector.load %arg1[%c0, %c0_0] : memref<3x128xf32, #tpu.memory_space<vmem>>, vector<3x128xf32>
    %c0_1 = arith.constant 0 : index
    %c0_2 = arith.constant 0 : index
    %1 = vector.load %arg2[%c0_1, %c0_2] : memref<128x3xf32, #tpu.memory_space<vmem>>, vector<128x3xf32>
    %cst = arith.constant dense<0.000000e+00> : vector<128x128xf32>
    %2 = tpu.matmul %1, %0, %cst {dimension_numbers = #tpu.dot_dimension_numbers<[1], [0], [0], [1], [0, 0, 1, 1], [], []>} : vector<128x3xf32>, vector<3x128xf32>, vector<128x128xf32> -> vector<128x128xf32>
    %c0_3 = arith.constant 0 : index
    %c0_4 = arith.constant 0 : index
    %3 = vector.load %arg3[%c0_3, %c0_4] : memref<128x1xf32, #tpu.memory_space<vmem>>, vector<128x1xf32>
    %4 = vector.broadcast %3 : vector<128x1xf32> to vector<128x128xf32>
    %5 = arith.addf %2, %4 : vector<128x128xf32>
    %cst_5 = arith.constant 0.000000e+00 : f32
    %6 = vector.broadcast %cst_5 : f32 to vector<128x128xf32>
    %7 = arith.maximumf %5, %6 : vector<128x128xf32>
    %c0_6 = arith.constant 0 : index
    %c0_7 = arith.constant 0 : index
    %8 = vector.load %arg4[%c0_6, %c0_7] : memref<64x128xf32, #tpu.memory_space<vmem>>, vector<64x128xf32>
    %cst_8 = arith.constant dense<0.000000e+00> : vector<64x128xf32>
    %9 = tpu.matmul %8, %7, %cst_8 {dimension_numbers = #tpu.dot_dimension_numbers<[1], [0], [0], [1], [0, 0, 1, 1], [], []>} : vector<64x128xf32>, vector<128x128xf32>, vector<64x128xf32> -> vector<64x128xf32>
    %c0_9 = arith.constant 0 : index
    %c0_10 = arith.constant 0 : index
    %10 = vector.load %arg5[%c0_9, %c0_10] : memref<64x1xf32, #tpu.memory_space<vmem>>, vector<64x1xf32>
    %11 = vector.broadcast %10 : vector<64x1xf32> to vector<64x128xf32>
    %12 = arith.addf %9, %11 : vector<64x128xf32>
    %cst_11 = arith.constant 0.000000e+00 : f32
    %13 = vector.broadcast %cst_11 : f32 to vector<64x128xf32>
    %14 = arith.maximumf %12, %13 : vector<64x128xf32>
    %c0_12 = arith.constant 0 : index
    %c0_13 = arith.constant 0 : index
    %15 = vector.load %arg6[%c0_12, %c0_13] : memref<64x1xf32, #tpu.memory_space<vmem>>, vector<64x1xf32>
    %16 = vector.broadcast %15 : vector<64x1xf32> to vector<64x128xf32>
    %17 = arith.mulf %14, %16 : vector<64x128xf32>
    %cst_14 = arith.constant dense<0.000000e+00> : vector<128xf32>
    %18 = vector.multi_reduction <add>, %17, %cst_14 [0] : vector<64x128xf32> to vector<128xf32>
    %19 = vector.shape_cast %18 : vector<128xf32> to vector<1x128xf32>
    %c0_15 = arith.constant 0 : index
    %c0_16 = arith.constant 0 : index
    %20 = memref.load %arg7[%c0_15, %c0_16] : memref<1x1xf32, #tpu.memory_space<smem>>
    %21 = vector.broadcast %20 : f32 to vector<1x128xf32>
    %22 = arith.addf %19, %21 : vector<1x128xf32>
    %23 = math.tanh %22 : vector<1x128xf32>
    %cst_17 = arith.constant 2.000000e+00 : f32
    %24 = vector.broadcast %cst_17 : f32 to vector<1x128xf32>
    %25 = arith.mulf %23, %24 : vector<1x128xf32>
    %c0_18 = arith.constant 0 : index
    %c0_19 = arith.constant 0 : index
    %26 = vector.load %arg8[%c0_18, %c0_19] : memref<1x128xf32, #tpu.memory_space<vmem>>, vector<1x128xf32>
    tpu.vector_store %arg8[%c0_18, %c0_19], %25 {strides = array<i32>} : memref<1x128xf32, #tpu.memory_space<vmem>>, vector<1x128xf32>,
    return
  }
  func.func @transform_0(%arg0: i32) -> (i32, i32) {
    %c0_i32 = arith.constant 0 : i32
    %c0_i32_0 = arith.constant 0 : i32
    return %c0_i32, %arg0 : i32, i32
  }
  func.func @transform_1(%arg0: i32) -> (i32, i32) {
    %c0_i32 = arith.constant 0 : i32
    %c0_i32_0 = arith.constant 0 : i32
    %c0_i32_1 = arith.constant 0 : i32
    return %c0_i32, %c0_i32_0 : i32, i32
  }
  func.func @transform_2(%arg0: i32) -> (i32, i32) {
    %c0_i32 = arith.constant 0 : i32
    %c0_i32_0 = arith.constant 0 : i32
    %c0_i32_1 = arith.constant 0 : i32
    return %c0_i32, %c0_i32_0 : i32, i32
  }
  func.func @transform_3(%arg0: i32) -> (i32, i32) {
    %c0_i32 = arith.constant 0 : i32
    %c0_i32_0 = arith.constant 0 : i32
    %c0_i32_1 = arith.constant 0 : i32
    return %c0_i32, %c0_i32_0 : i32, i32
  }
  func.func @transform_4(%arg0: i32) -> (i32, i32) {
    %c0_i32 = arith.constant 0 : i32
    %c0_i32_0 = arith.constant 0 : i32
    %c0_i32_1 = arith.constant 0 : i32
    return %c0_i32, %c0_i32_0 : i32, i32
  }
  func.func @transform_5(%arg0: i32) -> (i32, i32) {
    %c0_i32 = arith.constant 0 : i32
    %c0_i32_0 = arith.constant 0 : i32
    %c0_i32_1 = arith.constant 0 : i32
    return %c0_i32, %c0_i32_0 : i32, i32
  }
  func.func @transform_6(%arg0: i32) -> (i32, i32) {
    %c0_i32 = arith.constant 0 : i32
    %c0_i32_0 = arith.constant 0 : i32
    %c0_i32_1 = arith.constant 0 : i32
    return %c0_i32, %c0_i32_0 : i32, i32
  }
  func.func @transform_7(%arg0: i32) -> (i32, i32) {
    %c0_i32 = arith.constant 0 : i32
    %c0_i32_0 = arith.constant 0 : i32
    return %c0_i32, %arg0 : i32, i32
  }
}

</mosaic_0001>

<bundles_post_ra>
// kernel: tpu_custom_call.1
= control target key start
LH: loop header
LB: loop body
LE: loop exit
PB: predicated region body
PF: predicated region fallthrough
CT: control target
= control target key end

     0   :  { %vm190_vm0 = vcmask 1042432   ;;  %vm141_vm1 = vcmask 23552   ;;  %v801_v4 = vmov 0   ;;  %s1054_s0 = inlined_call_operand.vmem [shape: f32[3,128], index: 0, kind: input, shape index: {}]   ;;  %s1055_s1 = inlined_call_operand.vmem [shape: f32[128,3], index: 1, kind: input, shape index: {}]   ;;  %s1056_s2 = inlined_call_operand.vmem [shape: f32[128,1], index: 2, kind: input, shape index: {}]   ;;  %s1057_s3 = inlined_call_operand.vmem [shape: f32[64,128], index: 3, kind: input, shape index: {}]   ;;  %s1058_s4 = inlined_call_operand.vmem [shape: f32[64,1], index: 4, kind: input, shape index: {}]   ;;  %s1059_s5 = inlined_call_operand.vmem [shape: f32[64,1], index: 5, kind: input, shape index: {}]   ;;  %s1060_s6 = inlined_call_operand.<no memory space> [shape: f32[1,1], index: 6, kind: input, shape index: {}]   ;;  %s1061_s7 = inlined_call_operand.hbm [shape: f32[1,128], index: 7, kind: output, shape index: {}]  }
   0x1   :  { %v28_v0 = vld [vmem:[%s1054_s0] sm:$0x7]  ;;  %v30_v2 = vld [vmem:[%s1055_s1 + $0x8] sm:$0xff]  ;;  %v31_v3 = vld [vmem:[%s1055_s1 + $0x10] sm:$0xff]  ;;  %775 = vset.pattern.permute.xlu0 %v801_v4  ;;  %776 = vset.pattern.permute.xlu1 %v801_v4 }
   0x2   :  { %v29_v1 = vld [vmem:[%s1055_s1] sm:$0xff]  ;;  %671 = vmatprep.subr.msk.mxu0 %vm190_vm0, %v28_v0  ;;  %v32_v5 = vld [vmem:[%s1055_s1 + $0x18] sm:$0xff]  ;;  %v58_v8 = vld [vmem:[%s1056_s2 + $0x68] sm:$0xff] }
   0x3   :  { %673 = vmatprep.mubr.msk.f32.mxu0 %vm141_vm1, %v29_v1  ;;  %672 = vmatpush3.msk.msra.mxu0 %vm190_vm0, %v28_v0  ;;  %v33_v6 = vld [vmem:[%s1055_s1 + $0x20] sm:$0xff]  ;;  %v60_v7 = vld [vmem:[%s1056_s2 + $0x78] sm:$0xff]  ;;  %v59_v9 = vld [vmem:[%s1056_s2 + $0x70] sm:$0xff] }
   0x4   :  { %674 = vmatmul.mubr.msk.f32.vlgmr.msra.gmra.mxu0 %vm141_vm1, %v30_v2  ;;  %138 = vperm.xlu0 %775, %v60_v7   ;;  %v34_v10 = vld [vmem:[%s1055_s1 + $0x28] sm:$0xff]  ;;  %v57_v11 = vld [vmem:[%s1056_s2 + $0x60] sm:$0xff]  ;;  %v35_v12 = vld [vmem:[%s1055_s1 + $0x30] sm:$0xff] }
   0x5   :  { %676 = vmatprep.mubr.msk.f32.mxu0 %vm141_vm1, %v31_v3  ;;  %128 = vperm.xlu1 %776, %v58_v8   ;;  %v56_v13 = vld [vmem:[%s1056_s2 + $0x58] sm:$0xff]  ;;  %v55_v15 = vld [vmem:[%s1056_s2 + $0x50] sm:$0xff]  ;;  %v37_v16 = vld [vmem:[%s1055_s1 + $0x40] sm:$0xff] }
   0x6   :  { %v36_v14 = vld [vmem:[%s1055_s1 + $0x38] sm:$0xff]  ;;  %v54_v17 = vld [vmem:[%s1056_s2 + $0x48] sm:$0xff]  ;;  %v53_v19 = vld [vmem:[%s1056_s2 + $0x40] sm:$0xff] }
   0x7   :  { %v38_v18 = vld [vmem:[%s1055_s1 + $0x48] sm:$0xff] }
   0x8   :  { %677 = vmatmul.mubr.msk.f32.gmra.mxu0 %vm141_vm1, %v32_v5  ;;  %133 = vperm.xlu0 %775, %v59_v9  }
   0x9   :  { %679 = vmatprep.mubr.msk.f32.mxu0 %vm141_vm1, %v33_v6  ;;  %123 = vperm.xlu1 %776, %v57_v11  }
   0xc   :  { %680 = vmatmul.mubr.msk.f32.gmra.mxu0 %vm141_vm1, %v34_v10  ;;  %118 = vperm.xlu0 %775, %v56_v13  }
   0xd   :  { %682 = vmatprep.mubr.msk.f32.mxu0 %vm141_vm1, %v35_v12  ;;  %113 = vperm.xlu1 %776, %v55_v15  }
  0x10   :  { %683 = vmatmul.mubr.msk.f32.gmra.mxu0 %vm141_vm1, %v36_v14 }
  0x11   :  { %685 = vmatprep.mubr.msk.f32.mxu0 %vm141_vm1, %v37_v16 }
  0x12   :  { %13 = vsyncpa [#allocation4], 0  ;;  %v39_v20 = vld [vmem:[%s1055_s1 + $0x50] sm:$0xff]  ;;  %108 = vperm.xlu0 %775, %v54_v17   ;;  %103 = vperm.xlu1 %776, %v53_v19   ;;  %v52_v21 = vld [vmem:[%s1056_s2 + $0x38] sm:$0xff]  ;;  %s802_s13 = smov [#allocation3]  }
  0x13   :  { %v40_v22 = vld [vmem:[%s1055_s1 + $0x58] sm:$0xff]  ;;  %v51_v23 = vld [vmem:[%s1056_s2 + $0x30] sm:$0xff]  ;;  %v41_v24 = vld [vmem:[%s1055_s1 + $0x60] sm:$0xff]  ;;  %s605_s14 = sshll.u32 %s802_s13, 4  ;;  %s606_s14 = int_to_ptr.vmem [resolvable:$true] %s605_s14 }
  0x14   :  { %686 = vmatmul.mubr.msk.f32.gmra.mxu0 %vm141_vm1, %v38_v18  ;;  %v50_v25 = vld [vmem:[%s1056_s2 + $0x28] sm:$0xff]  ;;  %v49_v27 = vld [vmem:[%s1056_s2 + $0x20] sm:$0xff]  ;;  %v43_v28 = vld [vmem:[%s1055_s1 + $0x70] sm:$0xff]  ;;  %s779_s15 = scalar_lea.vmem %s606_s14, 16  ;;  %s783_s16 = scalar_lea.vmem %s606_s14, 32 }
  0x15   :  { %688 = vmatprep.mubr.msk.f32.mxu0 %vm141_vm1, %v39_v20  ;;  %v42_v26 = vld [vmem:[%s1055_s1 + $0x68] sm:$0xff]  ;;  %v48_v29 = vld [vmem:[%s1056_s2 + $0x18] sm:$0xff]  ;;  %v47_v31 = vld [vmem:[%s1056_s2 + $0x10] sm:$0xff]  ;;  %p780_p0 = scmp.ne.s32.totalorder %s606_s14, %s779_s15  ;;  %p784_p1 = scmp.lt.s32.totalorder %s606_s14, %s606_s14 }
  0x16   :  { %98 = vperm.xlu0 %775, %v52_v21   ;;  %93 = vperm.xlu1 %776, %v51_v23   ;;  %v44_v30 = vld [vmem:[%s1055_s1 + $0x78] sm:$0xff]  ;;  %v46_v32 = vld [vmem:[%s1056_s2 + $0x8] sm:$0xff]  ;;  %v45_v33 = vld [vmem:[%s1056_s2] sm:$0xff]  ;;  %p785_p2 = scmp.lt.s32.totalorder %s783_s16, %s779_s15 }
  0x17   :  { %v363_v34 = vld [vmem:[%s1058_s4] sm:$0xff]  ;;  %v364_v35 = vld [vmem:[%s1058_s4 + $0x8] sm:$0xff]  ;;  %v365_v36 = vld [vmem:[%s1058_s4 + $0x10] sm:$0xff] }
  0x18   :  { %689 = vmatmul.mubr.msk.f32.gmra.mxu0 %vm141_vm1, %v40_v22  ;;  %v366_v37 = vld [vmem:[%s1058_s4 + $0x18] sm:$0xff]  ;;  %v524_v38 = vld [vmem:[%s1059_s5] sm:$0xff]  ;;  %v525_v39 = vld [vmem:[%s1059_s5 + $0x8] sm:$0xff]  ;;  %p786_p3 = por %p785_p2, %p784_p1 }
  0x19   :  { %691 = vmatprep.mubr.msk.f32.mxu0 %vm141_vm1, %v41_v24  ;;  %v367_v40 = vld [vmem:[%s1058_s4 + $0x20] sm:$0xff]  ;;  %v526_v41 = vld [vmem:[%s1059_s5 + $0x10] sm:$0xff]  ;;  %v368_v42 = vld [vmem:[%s1058_s4 + $0x28] sm:$0xff] }
  0x1a   :  { %88 = vperm.xlu0 %775, %v50_v25   ;;  %83 = vperm.xlu1 %776, %v49_v27   ;;  %v527_v43 = vld [vmem:[%s1059_s5 + $0x18] sm:$0xff]  ;;  %v369_v44 = vld [vmem:[%s1058_s4 + $0x30] sm:$0xff]  ;;  %v528_v45 = vld [vmem:[%s1059_s5 + $0x20] sm:$0xff]  ;;  %p787_p4 = pnand %p786_p3, %p780_p0 }
  0x1b   :  { %v370_v46 = vld [vmem:[%s1058_s4 + $0x38] sm:$0xff]  ;;  %v529_v47 = vld [vmem:[%s1059_s5 + $0x28] sm:$0xff]  ;;  %v530_v48 = vld [vmem:[%s1059_s5 + $0x30] sm:$0xff] }
  0x1c   :  { %692 = vmatmul.mubr.msk.f32.gmra.mxu0 %vm141_vm1, %v42_v26  ;;  %v531_v49 = vld [vmem:[%s1059_s5 + $0x38] sm:$0xff]  ;;  %v355_v50 = vld [vmem:[%s1057_s3] sm:$0xff]  ;;  %v357_v51 = vld [vmem:[%s1057_s3 + $0x10] sm:$0xff] }
  0x1d   :  { %694 = vmatprep.mubr.msk.f32.mxu0 %vm141_vm1, %v43_v28  ;;  %732 = vmatprep.mubr.f32.mxu1 %v357_v51 }
  0x1e   :  { %78 = vperm.xlu0 %775, %v48_v29   ;;  %73 = vperm.xlu1 %776, %v47_v31  }
  0x20   :  { %695 = vmatmul.mubr.msk.f32.gmra.mxu0 %vm141_vm1, %v44_v30 }
  0x21   :  { %729 = vmatprep.mubr.f32.mxu0 %v355_v50 }
  0x22   :  { %68 = vperm.xlu0 %775, %v46_v32   ;;  %63 = vperm.xlu1 %776, %v45_v33  }
  0x26   :  { %373 = vperm.xlu0 %775, %v363_v34   ;;  %378 = vperm.xlu1 %776, %v364_v35  }
  0x2a   :  { %383 = vperm.xlu0 %775, %v365_v36   ;;  %388 = vperm.xlu1 %776, %v366_v37  }
  0x2e   :  { %534 = vperm.xlu0 %775, %v524_v38   ;;  %539 = vperm.xlu1 %776, %v525_v39  }
  0x32   :  { %393 = vperm.xlu0 %775, %v367_v40   ;;  %544 = vperm.xlu1 %776, %v526_v41  }
  0x36   :  { %398 = vperm.xlu0 %775, %v368_v42   ;;  %549 = vperm.xlu1 %776, %v527_v43  }
  0x3a   :  { %403 = vperm.xlu0 %775, %v369_v44   ;;  %554 = vperm.xlu1 %776, %v528_v45  }
  0x3e   :  { %408 = vperm.xlu0 %775, %v370_v46   ;;  %559 = vperm.xlu1 %776, %v529_v47  }
  0x42   :  { %564 = vperm.xlu0 %775, %v530_v48   ;;  %569 = vperm.xlu1 %776, %v531_v49  }
  0x7f   :  { %v139_v58 = vpop.permute.xlu0 %138 }
  0x80   :  { %v129_v60 = vpop.permute.xlu1 %128 }
  0x83   :  { %v134_v63 = vpop.permute.xlu0 %133 }
  0x84   :  { %v124_v1 = vpop.permute.xlu1 %123 }
  0x87   :  { %v119_v4 = vpop.permute.xlu0 %118 }
  0x88   :  { %v114_v6 = vpop.permute.xlu1 %113 }
  0x8d   :  { %v109_v10 = vpop.permute.xlu0 %108  ;;  %v104_v15 = vpop.permute.xlu1 %103 }
  0x91   :  { %v99_v20 = vpop.permute.xlu0 %98  ;;  %v94_v23 = vpop.permute.xlu1 %93 }
  0x95   :  { %v89_v28 = vpop.permute.xlu0 %88  ;;  %v84_v31 = vpop.permute.xlu1 %83 }
  0x99   :  { %v79_v36 = vpop.permute.xlu0 %78  ;;  %v74_v39 = vpop.permute.xlu1 %73 }
  0x9d   :  { %v69_v44 = vpop.permute.xlu0 %68  ;;  %v64_v47 = vpop.permute.xlu1 %63 }
  0xc4   :  { %v1012_v52 = vpop.f32.mrf.mxu0 }
  0xc5   :  { %v266_v45 = vadd.f32 %v1012_v52, %v69_v44  ;;  %v356_v52 = vld [vmem:[%s1057_s3 + $0x8] sm:$0xff] }
  0xc6   :  { %v1014_v53 = vpop.f32.mrf.mxu0 }
  0xc7   :  { %v261_v48 = vadd.f32 %v1014_v53, %v64_v47  ;;  %v340_v50 = vmax.f32 %v266_v45, 0.0  ;;  %v358_v53 = vld [vmem:[%s1057_s3 + $0x18] sm:$0xff] }
  0xc8   :  { %v1016_v54 = vpop.f32.mrf.mxu0 }
  0xc9   :  { %v276_v40 = vadd.f32 %v1016_v54, %v79_v36  ;;  %v339_v51 = vmax.f32 %v261_v48, 0.0  ;;  %v359_v54 = vld [vmem:[%s1057_s3 + $0x20] sm:$0xff] }
  0xca   :  { %v1018_v55 = vpop.f32.mrf.mxu0 }
  0xcb   :  { %v271_v42 = vadd.f32 %v1018_v55, %v74_v39  ;;  %v342_v46 = vmax.f32 %v276_v40, 0.0  ;;  %v360_v55 = vld [vmem:[%s1057_s3 + $0x28] sm:$0xff] }
  0xcc   :  { %v1020_v56 = vpop.f32.mrf.mxu0 }
  0xcd   :  { %v286_v34 = vadd.f32 %v1020_v56, %v89_v28  ;;  %v341_v49 = vmax.f32 %v271_v42, 0.0  ;;  %v361_v56 = vld [vmem:[%s1057_s3 + $0x30] sm:$0xff] }
  0xce   :  { %v1022_v57 = vpop.f32.mrf.mxu0 }
  0xcf   :  { %v281_v37 = vadd.f32 %v1022_v57, %v84_v31  ;;  %v344_v41 = vmax.f32 %v286_v34, 0.0  ;;  %v362_v57 = vld [vmem:[%s1057_s3 + $0x38] sm:$0xff] }
  0xd0   :  { %v684_v59 = vpop.f32.mrf.mxu0 }
  0xd1   :  { %v296_v29 = vadd.f32 %v684_v59, %v99_v20  ;;  %v343_v43 = vmax.f32 %v281_v37, 0.0  ;;  %v379_v59 = vpop.permute.xlu1 %378 }
  0xd2   :  { %v290_v61 = vpop.f32.mrf.mxu0 }
  0xd3   :  { %v291_v32 = vadd.f32 %v290_v61, %v94_v23  ;;  %v346_v35 = vmax.f32 %v296_v29, 0.0 }
  0xd4   :  { %v687_v62 = vpop.f32.mrf.mxu0 }
  0xd5   :  { %v306_v24 = vadd.f32 %v687_v62, %v109_v10  ;;  %v345_v38 = vmax.f32 %v291_v32, 0.0  ;;  %v389_v61 = vpop.permute.xlu1 %388 }
  0xd6   :  { %v300_v0 = vpop.f32.mrf.mxu0 }
  0xd7   :  { %v301_v26 = vadd.f32 %v300_v0, %v104_v15  ;;  %v348_v30 = vmax.f32 %v306_v24, 0.0 }
  0xd8   :  { %v690_v2 = vpop.f32.mrf.mxu0 }
  0xd9   :  { %v316_v18 = vadd.f32 %v690_v2, %v119_v4  ;;  %v347_v33 = vmax.f32 %v301_v26, 0.0 }
  0xda   :  { %v310_v3 = vpop.f32.mrf.mxu0 }
  0xdb   :  { %v311_v21 = vadd.f32 %v310_v3, %v114_v6  ;;  %v350_v25 = vmax.f32 %v316_v18, 0.0 }
  0xdc   :  { %v693_v5 = vpop.f32.mrf.mxu0 }
  0xdd   :  { %v326_v12 = vadd.f32 %v693_v5, %v129_v60  ;;  %v349_v27 = vmax.f32 %v311_v21, 0.0 }
  0xde   :  { %v320_v7 = vpop.f32.mrf.mxu0 }
  0xdf   :  { %v321_v16 = vadd.f32 %v320_v7, %v124_v1  ;;  %v352_v19 = vmax.f32 %v326_v12, 0.0 }
  0xe0   :  { %v696_v8 = vpop.f32.mrf.mxu0 }
  0xe1   :  { %v336_v9 = vadd.f32 %v696_v8, %v139_v58  ;;  %v351_v22 = vmax.f32 %v321_v16, 0.0  ;;  %v374_v58 = vpop.permute.xlu0 %373 }
  0xe2   :  { %v330_v11 = vpop.f32.mrf.mxu0 }
  0xe3   :  { %v354_v13 = vmax.f32 %v336_v9, 0.0  ;;  %v331_v14 = vadd.f32 %v330_v11, %v134_v63  ;;  %v540_v63 = vpop.permute.xlu1 %539 }
  0xe5   :  { %v353_v17 = vmax.f32 %v331_v14, 0.0  ;;  %697 = vmatprep.subr.mxu0 %v354_v13  ;;  %741 = vmatprep.subr.mxu1 %v354_v13  ;;  %v384_v60 = vpop.permute.xlu0 %383 }
  0xe6   :  { %698 = vmatpush3.msra.mxu0 %v354_v13  ;;  %757 = vmatpush3.msra.mxu1 %v354_v13 }
  0xe7   :  { %699 = vmatprep.subr.mxu0 %v353_v17  ;;  %742 = vmatprep.subr.mxu1 %v353_v17  ;;  %v545_v1 = vpop.permute.xlu1 %544 }
  0xe8   :  { %700 = vmatpush3.msra.mxu0 %v353_v17  ;;  %758 = vmatpush3.msra.mxu1 %v353_v17 }
  0xe9   :  { %701 = vmatprep.subr.mxu0 %v352_v19  ;;  %743 = vmatprep.subr.mxu1 %v352_v19  ;;  %v535_v62 = vpop.permute.xlu0 %534 }
  0xea   :  { %702 = vmatpush3.msra.mxu0 %v352_v19  ;;  %759 = vmatpush3.msra.mxu1 %v352_v19 }
  0xeb   :  { %703 = vmatprep.subr.mxu0 %v351_v22  ;;  %744 = vmatprep.subr.mxu1 %v351_v22  ;;  %v550_v3 = vpop.permute.xlu1 %549 }
  0xec   :  { %704 = vmatpush3.msra.mxu0 %v351_v22  ;;  %760 = vmatpush3.msra.mxu1 %v351_v22 }
  0xed   :  { %705 = vmatprep.subr.mxu0 %v350_v25  ;;  %745 = vmatprep.subr.mxu1 %v350_v25  ;;  %v394_v0 = vpop.permute.xlu0 %393 }
  0xee   :  { %706 = vmatpush3.msra.mxu0 %v350_v25  ;;  %761 = vmatpush3.msra.mxu1 %v350_v25 }
  0xef   :  { %707 = vmatprep.subr.mxu0 %v349_v27  ;;  %746 = vmatprep.subr.mxu1 %v349_v27  ;;  %v555_v17 = vpop.permute.xlu1 %554 }
  0xf0   :  { %708 = vmatpush3.msra.mxu0 %v349_v27  ;;  %762 = vmatpush3.msra.mxu1 %v349_v27 }
  0xf1   :  { %709 = vmatprep.subr.mxu0 %v348_v30  ;;  %747 = vmatprep.subr.mxu1 %v348_v30  ;;  %v399_v2 = vpop.permute.xlu0 %398 }
  0xf2   :  { %710 = vmatpush3.msra.mxu0 %v348_v30  ;;  %763 = vmatpush3.msra.mxu1 %v348_v30 }
  0xf3   :  { %711 = vmatprep.subr.mxu0 %v347_v33  ;;  %748 = vmatprep.subr.mxu1 %v347_v33 }
  0xf4   :  { %712 = vmatpush3.msra.mxu0 %v347_v33  ;;  %764 = vmatpush3.msra.mxu1 %v347_v33 }
  0xf5   :  { %713 = vmatprep.subr.mxu0 %v346_v35  ;;  %749 = vmatprep.subr.mxu1 %v346_v35  ;;  %v404_v13 = vpop.permute.xlu0 %403 }
  0xf6   :  { %714 = vmatpush3.msra.mxu0 %v346_v35  ;;  %765 = vmatpush3.msra.mxu1 %v346_v35  ;;  %v560_v35 = vpop.permute.xlu1 %559 }
  0xf7   :  { %715 = vmatprep.subr.mxu0 %v345_v38  ;;  %750 = vmatprep.subr.mxu1 %v345_v38 }
  0xf8   :  { %716 = vmatpush3.msra.mxu0 %v345_v38  ;;  %766 = vmatpush3.msra.mxu1 %v345_v38 }
  0xf9   :  { %717 = vmatprep.subr.mxu0 %v344_v41  ;;  %751 = vmatprep.subr.mxu1 %v344_v41  ;;  %v409_v28 = vpop.permute.xlu0 %408 }
  0xfa   :  { %718 = vmatpush3.msra.mxu0 %v344_v41  ;;  %767 = vmatpush3.msra.mxu1 %v344_v41  ;;  %v570_v45 = vpop.permute.xlu1 %569 }
  0xfb   :  { %719 = vmatprep.subr.mxu0 %v343_v43  ;;  %752 = vmatprep.subr.mxu1 %v343_v43 }
  0xfc   :  { %720 = vmatpush3.msra.mxu0 %v343_v43  ;;  %768 = vmatpush3.msra.mxu1 %v343_v43 }
  0xfd   :  { %721 = vmatprep.subr.mxu0 %v342_v46  ;;  %753 = vmatprep.subr.mxu1 %v342_v46  ;;  %v565_v42 = vpop.permute.xlu0 %564 }
  0xfe   :  { %722 = vmatpush3.msra.mxu0 %v342_v46  ;;  %769 = vmatpush3.msra.mxu1 %v342_v46 }
  0xff   :  { %723 = vmatprep.subr.mxu0 %v341_v49  ;;  %754 = vmatprep.subr.mxu1 %v341_v49 }
 0x100   :  { %724 = vmatpush3.msra.mxu0 %v341_v49  ;;  %770 = vmatpush3.msra.mxu1 %v341_v49 }
 0x101   :  { %725 = vmatprep.subr.mxu0 %v340_v50  ;;  %755 = vmatprep.subr.mxu1 %v340_v50 }
 0x102   :  { %726 = vmatpush3.msra.mxu0 %v340_v50  ;;  %771 = vmatpush3.msra.mxu1 %v340_v50 }
 0x103   :  { %727 = vmatprep.subr.mxu0 %v339_v51  ;;  %756 = vmatprep.subr.mxu1 %v339_v51 }
 0x104   :  { %728 = vmatpush3.msra.mxu0 %v339_v51  ;;  %772 = vmatpush3.msra.mxu1 %v339_v51 }
 0x105   :  { %730 = vmatmul.mubr.f32.vlgmr.msra.gmra.mxu0 %v356_v52  ;;  %733 = vmatmul.mubr.f32.vlgmr.msra.gmra.mxu1 %v358_v53 }
 0x106   :  { %735 = vmatprep.mubr.f32.mxu1 %v359_v54  ;;  %v594_v54 = vstv %s1060_s6 }
 0x109   :  { %736 = vmatmul.mubr.f32.gmra.mxu1 %v360_v55 }
 0x10a   :  { %738 = vmatprep.mubr.f32.mxu1 %v361_v56 }
 0x10d   :  { %739 = vmatmul.mubr.f32.gmra.mxu1 %v362_v57 }
 0x1c5   :  { %v731_v4 = vpop.f32.mrf.mxu0  ;;  %v734_v5 = vpop.f32.mrf.mxu1 }
 0x1c6   :  { %v483_v6 = vadd.f32 %v731_v4, %v379_v59  ;;  %v493_v7 = vadd.f32 %v734_v5, %v389_v61 }
 0x1c7   :  { %v477_v8 = vpop.f32.mrf.mxu0  ;;  %v487_v9 = vpop.f32.mrf.mxu1 }
 0x1c8   :  { %v517_v10 = vmax.f32 %v483_v6, 0.0  ;;  %v478_v11 = vadd.f32 %v477_v8, %v374_v58  ;;  %v488_v12 = vadd.f32 %v487_v9, %v384_v60  ;;  %v519_v18 = vmax.f32 %v493_v7, 0.0 }
 0x1c9   :  { %v737_v14 = vpop.f32.mrf.mxu1 }
 0x1ca   :  { %v516_v15 = vmax.f32 %v478_v11, 0.0  ;;  %v518_v16 = vmax.f32 %v488_v12, 0.0  ;;  %v573_v20 = vmul.f32 %v540_v63, %v517_v10  ;;  %v503_v22 = vadd.f32 %v737_v14, %v399_v2 }
 0x1cb   :  { %v497_v19 = vpop.f32.mrf.mxu1  ;;  %v575_v29 = vmul.f32 %v550_v3, %v519_v18 }
 0x1cc   :  { %v572_v21 = vmul.f32 %v535_v62, %v516_v15  ;;  %v498_v23 = vadd.f32 %v497_v19, %v394_v0  ;;  %v574_v26 = vmul.f32 %v545_v1, %v518_v16  ;;  %v521_v32 = vmax.f32 %v503_v22, 0.0 }
 0x1cd   :  { %v740_v24 = vpop.f32.mrf.mxu1 }
 0x1ce   :  { %v580_v25 = vadd.f32 %v573_v20, %v572_v21  ;;  %v520_v27 = vmax.f32 %v498_v23, 0.0  ;;  %v513_v33 = vadd.f32 %v740_v24, %v409_v28  ;;  %v577_v39 = vmul.f32 %v560_v35, %v521_v32 }
 0x1cf   :  { %v507_v30 = vpop.f32.mrf.mxu1 }
 0x1d0   :  { %v581_v31 = vadd.f32 %v580_v25, %v574_v26  ;;  %v508_v34 = vadd.f32 %v507_v30, %v404_v13  ;;  %v576_v36 = vmul.f32 %v555_v17, %v520_v27  ;;  %v523_v41 = vmax.f32 %v513_v33, 0.0 }
 0x1d2   :  { %v582_v37 = vadd.f32 %v581_v31, %v575_v29  ;;  %v522_v38 = vmax.f32 %v508_v34, 0.0  ;;  %v579_v46 = vmul.f32 %v570_v45, %v523_v41 }
 0x1d4   :  { %v583_v40 = vadd.f32 %v582_v37, %v576_v36  ;;  %v578_v43 = vmul.f32 %v565_v42, %v522_v38 }
 0x1d6   :  { %v584_v44 = vadd.f32 %v583_v40, %v577_v39 }
 0x1d8   :  { %v585_v47 = vadd.f32 %v584_v44, %v578_v43 }
 0x1da   :  { %v586_v48 = vadd.f32 %v585_v47, %v579_v46 }
 0x1dc   :  { %v587_v49 = vrot.slane %v586_v48, 4 }
 0x1de   :  { %v588_v50 = vadd.f32 %v587_v49, %v586_v48 }
 0x1e0   :  { %v589_v51 = vrot.slane %v588_v50, 2 }
 0x1e2   :  { %v590_v52 = vadd.f32 %v589_v51, %v588_v50 }
 0x1e4   :  { %v591_v53 = vrot.slane %v590_v52, 1 }
 0x1e6   :  { %v592_v55 = vadd.f32 %v591_v53, %v590_v52 }
 0x1e8   :  { %v595_v56 = vadd.f32 %v594_v54, %v592_v55 }
 0x1ea   :  { %777 = vtanh.f32 %v595_v56 }
 0x1f7   :  { %v778_v57 = vpop.eup %777 }
 0x1f8   :  { %v597_v58 = vmul.f32 2.0, %v778_v57 }
 0x1fa   :  { %598 = vst [vmem:[#allocation3] sm:$0x1] %v597_v58 }
 0x1fb   :  { %790 = shalt.err (!%p787_p4)
}
 0x1fc   :  { %608 = dma.vmem_to_hbm [thread:$0]  %s606_s14, 16, %s1061_s7, [#allocation4]  }
 0x1fd   :  { %799 = dma.done.wait [#allocation4], 16  }
 0x1fe   :  { %800 = vsyncadd [#allocation4], 4294967280 }
 0x1ff   :  { %612 = vsyncpa [#allocation4], 1 }

</bundles_post_ra>
